<compile_context>
chip_gen: v5e
topology: v5e:2x2
jax: 0.10.0
libtpu: 0.0.40
codegen_flags: <defaults>
</compile_context>

<pallas_src>
import math

import jax
import jax.numpy as jnp
from jax import lax
from jax.experimental import pallas as pl
from jax.experimental.pallas import tpu as pltpu

LANES = 1024      # lane dim of the flattened slab (multiple of 128)
ACC_ROWS = 8      # sublane-height of the VMEM accumulator


def _device_kind() -> str:
    try:
        return jax.devices()[0].device_kind.lower()
    except Exception:
        return ""


def _is_v7x() -> bool:
    kind = _device_kind()
    return ("v7" in kind) or ("tpu7" in kind)


def _make_loss_kernel(in_gamma: float, gamma_s: float, *, tile_m: int,
                      rows: int, needs_mask: bool):
    groups = tile_m // ACC_ROWS

    def kernel(x_ref, t_ref, o_ref, acc_ref):
        shard = pl.program_id(0)
        t_idx = pl.program_id(1)
        gtile = shard * pl.num_programs(1) + t_idx

        def accumulate(masked: bool):
            x = x_ref[...].astype(jnp.float32)
            tgt = t_ref[...].astype(jnp.float32)
            delta = (tgt - x) ** 2
            w = 1.0 - gamma_s * jnp.exp(-in_gamma * tgt)
            wd = w * delta
            if masked:
                # Rows at/after `rows` are undefined DMA padding (or belong to
                # another shard's clamped tile) -> force their contribution to 0.
                valid = rows - gtile * tile_m
                row_ids = lax.broadcasted_iota(jnp.int32, (tile_m, LANES), 0)
                wd = jnp.where(row_ids < valid, wd, 0.0)
            if groups > 1:
                # Sublane-group reduce: pure vreg adds (VALU), no XLU, so the
                # accumulator read-modify-write only touches 8 sublanes.
                partial = wd.reshape(groups, ACC_ROWS, LANES).sum(axis=0)
            else:
                partial = wd

            @pl.when(t_idx == 0)
            def _assign():
                acc_ref[...] = partial

            @pl.when(t_idx != 0)
            def _add():
                acc_ref[...] += partial

        if needs_mask:
            valid_rows = rows - gtile * tile_m

            @pl.when(valid_rows >= tile_m)
            def _full_tile():
                accumulate(False)

            @pl.when(valid_rows < tile_m)
            def _partial_tile():
                accumulate(True)
        else:
            accumulate(False)

        @pl.when(t_idx == pl.num_programs(1) - 1)
        def _finalize():
            # Single cross-lane/sublane reduce per shard (8 vregs) -> SMEM.
            o_ref[0, 0] = jnp.sum(acc_ref[...])

    return kernel


def regression_loss(inp, target, in_gamma: float, gamma_s: float = 0.9,
                    max_tile_rows: int = 512):
    assert inp.shape == target.shape
    batch = inp.shape[0]
    total = math.prod(inp.shape)
    rows = -(-total // LANES)                      # ceil

    if total == rows * LANES:
        # Common case: free reshape, no extra HBM traffic.
        x2d = inp.reshape(rows, LANES)
        t2d = target.reshape(rows, LANES)
    else:
        # Rare ragged case: one pad copy; zero pad is exact (delta == 0 there).
        pad = rows * LANES - total
        x2d = jnp.pad(inp.reshape(-1), (0, pad)).reshape(rows, LANES)
        t2d = jnp.pad(target.reshape(-1), (0, pad)).reshape(rows, LANES)

    is_v7 = _is_v7x()
    num_shards = 2 if is_v7 else 1                 # v5e/v6e: single TensorCore

    rows_per_shard = -(-rows // num_shards)
    tile_m = max(ACC_ROWS,
                 min(max_tile_rows, -(-rows_per_shard // ACC_ROWS) * ACC_ROWS))
    tiles_total = -(-rows // tile_m)
    if tiles_total < num_shards:
        num_shards = 1
    tiles_per_shard = -(-tiles_total // num_shards)
    needs_mask = (rows != tiles_total * tile_m) or \
                 (num_shards * tiles_per_shard != tiles_total)

    kernel = _make_loss_kernel(float(in_gamma), float(gamma_s),
                               tile_m=tile_m, rows=rows, needs_mask=needs_mask)

    last_tile = tiles_total - 1

    def in_map(s, t):
        # Clamp so an unbalanced shard never requests an out-of-bounds block;
        # its surplus tile is fully masked to zero inside the kernel.
        return (jnp.minimum(s * tiles_per_shard + t, last_tile), 0)

    spec_kwargs = {"pipeline_mode": pl.Buffered(3)} if is_v7 else {}
    in_spec = pl.BlockSpec((tile_m, LANES), in_map, **spec_kwargs)

    itemsize = jnp.dtype(inp.dtype).itemsize
    cost = pl.CostEstimate(
        flops=8 * rows * LANES,
        transcendentals=rows * LANES,
        bytes_accessed=2 * rows * LANES * itemsize + num_shards * 4,
    )

    partials = pl.pallas_call(
        kernel,
        out_shape=jax.ShapeDtypeStruct((num_shards, 1), jnp.float32),
        grid=(num_shards, tiles_per_shard),
        in_specs=[in_spec, in_spec],
        out_specs=pl.BlockSpec((1, 1), lambda s, t: (s, 0),
                               memory_space=pltpu.SMEM),
        scratch_shapes=[pltpu.VMEM((ACC_ROWS, LANES), jnp.float32)],
        compiler_params=pltpu.CompilerParams(
            dimension_semantics=("parallel", "arbitrary"),
            vmem_limit_bytes=32 * 1024 * 1024,
        ),
        cost_estimate=cost,
    )(x2d, t2d)

    # mean over dim 0 then sum over the rest == total sum / batch
    return jnp.sum(partials) / jnp.float32(batch)


def regression_loss_ref(inp, target, in_gamma: float, gamma_s: float = 0.9):
    delta = (target - inp) ** 2
    w = 1.0 - gamma_s * jnp.exp(-in_gamma * target)
    return jnp.sum(jnp.mean(w * delta, axis=0))


if __name__ == "__main__":
    key = jax.random.PRNGKey(0)
    k1, k2, k3, k4, k5, k6 = jax.random.split(key, 6)

    in_gamma = 0.5   # module __init__ arg (deterministic constant)
    gamma_s = 0.9

    # 1) Small NCHW shapes: batch=2, channels=4, spatial=16x16 (2 rows, masked tile).
    shape = (2, 4, 16, 16)
    inp = jax.random.normal(k1, shape, dtype=jnp.float32)
    tgt = jax.random.normal(k2, shape, dtype=jnp.float32)
    out = jax.block_until_ready(regression_loss(inp, tgt, in_gamma, gamma_s))
    ref = regression_loss_ref(inp, tgt, in_gamma, gamma_s)
    assert jnp.allclose(out, ref, rtol=1e-5, atol=1e-5), (out, ref)

    # 2) Multi-tile accumulation path (small tile cap forces several inner steps).
    shape2 = (2, 8, 64, 64)
    inp2 = jax.random.normal(k3, shape2, dtype=jnp.float32)
    tgt2 = jax.random.normal(k4, shape2, dtype=jnp.float32)
    out2 = jax.block_until_ready(
        regression_loss(inp2, tgt2, in_gamma, gamma_s, max_tile_rows=8))
    ref2 = regression_loss_ref(inp2, tgt2, in_gamma, gamma_s)
    assert jnp.allclose(out2, ref2, rtol=1e-4, atol=1e-4), (out2, ref2)

    # 3) Ragged total (not a multiple of 1024): exercises the pad + mask path.
    shape3 = (3, 5, 7, 11)
    inp3 = jax.random.normal(k5, shape3, dtype=jnp.float32)
    tgt3 = jax.random.normal(k6, shape3, dtype=jnp.float32)
    out3 = jax.block_until_ready(regression_loss(inp3, tgt3, in_gamma, gamma_s))
    ref3 = regression_loss_ref(inp3, tgt3, in_gamma, gamma_s)
    assert jnp.allclose(out3, ref3, rtol=1e-5, atol=1e-5), (out3, ref3)

    print("KERNEL_OK")
</pallas_src>

<mosaic_0001>
module attributes {stable_mosaic.version = 11 : i64} {
  func.func @kernel(%arg0: i32, %arg1: i32, %arg2: memref<8x1024xf32, #tpu.memory_space<vmem>>, %arg3: memref<8x1024xf32, #tpu.memory_space<vmem>>, %arg4: memref<1x1xf32, #tpu.memory_space<smem>>, %arg5: memref<8x1024xf32, #tpu.memory_space<vmem>>) attributes {dimension_semantics = [#tpu.dimension_semantics<parallel>, #tpu.dimension_semantics<arbitrary>], iteration_bounds = array<i64: 1, 1>, scalar_prefetch = 0 : i64, scratch_operands = 1 : i64, tpu.core_type = #tpu.core_type<tc>, window_params = [{transform_indices = @transform_0, window_bounds = array<i64: 8, 1024>}, {transform_indices = @transform_1, window_bounds = array<i64: 8, 1024>}, {transform_indices = @transform_2, window_bounds = array<i64: 1, 1>}]} {
    %c1_i32 = arith.constant 1 : i32
    %0 = arith.muli %arg0, %c1_i32 : i32
    %1 = arith.addi %0, %arg1 : i32
    %c8_i32 = arith.constant 8 : i32
    %2 = arith.muli %1, %c8_i32 : i32
    %c2_i32 = arith.constant 2 : i32
    %3 = arith.subi %c2_i32, %2 : i32
    %c8_i32_0 = arith.constant 8 : i32
    %4 = arith.cmpi sge, %3, %c8_i32_0 : i32
    %5 = arith.extui %4 : i1 to i32
    %c0_i32 = arith.constant 0 : i32
    %6 = arith.cmpi ne, %5, %c0_i32 : i32
    scf.if %6 {
      %c0 = arith.constant 0 : index
      %c0_5 = arith.constant 0 : index
      %13 = vector.load %arg2[%c0, %c0_5] : memref<8x1024xf32, #tpu.memory_space<vmem>>, vector<8x1024xf32>
      %c0_6 = arith.constant 0 : index
      %c0_7 = arith.constant 0 : index
      %14 = vector.load %arg3[%c0_6, %c0_7] : memref<8x1024xf32, #tpu.memory_space<vmem>>, vector<8x1024xf32>
      %15 = arith.subf %14, %13 : vector<8x1024xf32>
      %16 = arith.mulf %15, %15 : vector<8x1024xf32>
      %cst = arith.constant -5.000000e-01 : f32
      %17 = vector.broadcast %cst : f32 to vector<8x1024xf32>
      %18 = arith.mulf %17, %14 : vector<8x1024xf32>
      %19 = math.exp %18 : vector<8x1024xf32>
      %cst_8 = arith.constant 0.899999976 : f32
      %20 = vector.broadcast %cst_8 : f32 to vector<8x1024xf32>
      %21 = arith.mulf %20, %19 : vector<8x1024xf32>
      %cst_9 = arith.constant 1.000000e+00 : f32
      %22 = vector.broadcast %cst_9 : f32 to vector<8x1024xf32>
      %23 = arith.subf %22, %21 : vector<8x1024xf32>
      %24 = arith.mulf %23, %16 : vector<8x1024xf32>
      %c0_i32_10 = arith.constant 0 : i32
      %25 = arith.cmpi eq, %arg1, %c0_i32_10 : i32
      %26 = arith.extui %25 : i1 to i32
      %c0_i32_11 = arith.constant 0 : i32
      %27 = arith.cmpi ne, %26, %c0_i32_11 : i32
      scf.if %27 {
        %c0_14 = arith.constant 0 : index
        %c0_15 = arith.constant 0 : index
        %31 = vector.load %arg5[%c0_14, %c0_15] : memref<8x1024xf32, #tpu.memory_space<vmem>>, vector<8x1024xf32>
        tpu.vector_store %arg5[%c0_14, %c0_15], %24 {strides = array<i32>} : memref<8x1024xf32, #tpu.memory_space<vmem>>, vector<8x1024xf32>,
      } else {
      }
      %c0_i32_12 = arith.constant 0 : i32
      %28 = arith.cmpi ne, %arg1, %c0_i32_12 : i32
      %29 = arith.extui %28 : i1 to i32
      %c0_i32_13 = arith.constant 0 : i32
      %30 = arith.cmpi ne, %29, %c0_i32_13 : i32
      scf.if %30 {
        %c0_14 = arith.constant 0 : index
        %c0_15 = arith.constant 0 : index
        %31 = vector.load %arg5[%c0_14, %c0_15] : memref<8x1024xf32, #tpu.memory_space<vmem>>, vector<8x1024xf32>
        %32 = arith.addf %31, %24 : vector<8x1024xf32>
        %c0_16 = arith.constant 0 : index
        %c0_17 = arith.constant 0 : index
        %33 = vector.load %arg5[%c0_16, %c0_17] : memref<8x1024xf32, #tpu.memory_space<vmem>>, vector<8x1024xf32>
        tpu.vector_store %arg5[%c0_16, %c0_17], %32 {strides = array<i32>} : memref<8x1024xf32, #tpu.memory_space<vmem>>, vector<8x1024xf32>,
      } else {
      }
    } else {
    }
    %c8_i32_1 = arith.constant 8 : i32
    %7 = arith.cmpi slt, %3, %c8_i32_1 : i32
    %8 = arith.extui %7 : i1 to i32
    %c0_i32_2 = arith.constant 0 : i32
    %9 = arith.cmpi ne, %8, %c0_i32_2 : i32
    scf.if %9 {
      %c0 = arith.constant 0 : index
      %c0_5 = arith.constant 0 : index
      %13 = vector.load %arg2[%c0, %c0_5] : memref<8x1024xf32, #tpu.memory_space<vmem>>, vector<8x1024xf32>
      %c0_6 = arith.constant 0 : index
      %c0_7 = arith.constant 0 : index
      %14 = vector.load %arg3[%c0_6, %c0_7] : memref<8x1024xf32, #tpu.memory_space<vmem>>, vector<8x1024xf32>
      %15 = arith.subf %14, %13 : vector<8x1024xf32>
      %16 = arith.mulf %15, %15 : vector<8x1024xf32>
      %cst = arith.constant -5.000000e-01 : f32
      %17 = vector.broadcast %cst : f32 to vector<8x1024xf32>
      %18 = arith.mulf %17, %14 : vector<8x1024xf32>
      %19 = math.exp %18 : vector<8x1024xf32>
      %cst_8 = arith.constant 0.899999976 : f32
      %20 = vector.broadcast %cst_8 : f32 to vector<8x1024xf32>
      %21 = arith.mulf %20, %19 : vector<8x1024xf32>
      %cst_9 = arith.constant 1.000000e+00 : f32
      %22 = vector.broadcast %cst_9 : f32 to vector<8x1024xf32>
      %23 = arith.subf %22, %21 : vector<8x1024xf32>
      %24 = arith.mulf %23, %16 : vector<8x1024xf32>
      %c8_i32_10 = arith.constant 8 : i32
      %25 = arith.muli %1, %c8_i32_10 : i32
      %c2_i32_11 = arith.constant 2 : i32
      %26 = arith.subi %c2_i32_11, %25 : i32
      %27 = tpu.iota {dimensions = array<i32: 0>} : vector<8x1024xi32>
      %28 = vector.broadcast %26 : i32 to vector<8x1024xi32>
      %29 = arith.cmpi slt, %27, %28 : vector<8x1024xi32>
      %cst_12 = arith.constant 0.000000e+00 : f32
      %30 = vector.broadcast %cst_12 : f32 to vector<8x1024xf32>
      %31 = arith.select %29, %24, %30 : vector<8x1024xi1>, vector<8x1024xf32>
      %c0_i32_13 = arith.constant 0 : i32
      %32 = arith.cmpi eq, %arg1, %c0_i32_13 : i32
      %33 = arith.extui %32 : i1 to i32
      %c0_i32_14 = arith.constant 0 : i32
      %34 = arith.cmpi ne, %33, %c0_i32_14 : i32
      scf.if %34 {
        %c0_17 = arith.constant 0 : index
        %c0_18 = arith.constant 0 : index
        %38 = vector.load %arg5[%c0_17, %c0_18] : memref<8x1024xf32, #tpu.memory_space<vmem>>, vector<8x1024xf32>
        tpu.vector_store %arg5[%c0_17, %c0_18], %31 {strides = array<i32>} : memref<8x1024xf32, #tpu.memory_space<vmem>>, vector<8x1024xf32>,
      } else {
      }
      %c0_i32_15 = arith.constant 0 : i32
      %35 = arith.cmpi ne, %arg1, %c0_i32_15 : i32
      %36 = arith.extui %35 : i1 to i32
      %c0_i32_16 = arith.constant 0 : i32
      %37 = arith.cmpi ne, %36, %c0_i32_16 : i32
      scf.if %37 {
        %c0_17 = arith.constant 0 : index
        %c0_18 = arith.constant 0 : index
        %38 = vector.load %arg5[%c0_17, %c0_18] : memref<8x1024xf32, #tpu.memory_space<vmem>>, vector<8x1024xf32>
        %39 = arith.addf %38, %31 : vector<8x1024xf32>
        %c0_19 = arith.constant 0 : index
        %c0_20 = arith.constant 0 : index
        %40 = vector.load %arg5[%c0_19, %c0_20] : memref<8x1024xf32, #tpu.memory_space<vmem>>, vector<8x1024xf32>
        tpu.vector_store %arg5[%c0_19, %c0_20], %39 {strides = array<i32>} : memref<8x1024xf32, #tpu.memory_space<vmem>>, vector<8x1024xf32>,
      } else {
      }
    } else {
    }
    %c0_i32_3 = arith.constant 0 : i32
    %10 = arith.cmpi eq, %arg1, %c0_i32_3 : i32
    %11 = arith.extui %10 : i1 to i32
    %c0_i32_4 = arith.constant 0 : i32
    %12 = arith.cmpi ne, %11, %c0_i32_4 : i32
    scf.if %12 {
      %c0 = arith.constant 0 : index
      %c0_5 = arith.constant 0 : index
      %13 = vector.load %arg5[%c0, %c0_5] : memref<8x1024xf32, #tpu.memory_space<vmem>>, vector<8x1024xf32>
      %14 = vector.shape_cast %13 : vector<8x1024xf32> to vector<1x8x1024xf32>
      %cst = arith.constant dense<0.000000e+00> : vector<1xf32>
      %15 = vector.multi_reduction <add>, %14, %cst [1, 2] : vector<1x8x1024xf32> to vector<1xf32>
      %16 = vector.shape_cast %15 : vector<1xf32> to vector<1x1x1xf32>
      %17 = vector.extract %16[0, 0, 0] : f32 from vector<1x1x1xf32>
      %c0_6 = arith.constant 0 : index
      %c0_7 = arith.constant 0 : index
      %18 = memref.load %arg4[%c0_6, %c0_7] : memref<1x1xf32, #tpu.memory_space<smem>>
      memref.store %17, %arg4[%c0_6, %c0_7] : memref<1x1xf32, #tpu.memory_space<smem>>
    } else {
    }
    return
  }
  func.func @transform_0(%arg0: i32, %arg1: i32) -> (i32, i32) {
    %c1_i32 = arith.constant 1 : i32
    %0 = arith.muli %arg0, %c1_i32 : i32
    %1 = arith.addi %0, %arg1 : i32
    %c0_i32 = arith.constant 0 : i32
    %2 = arith.minsi %1, %c0_i32 : i32
    %c0_i32_0 = arith.constant 0 : i32
    %c0_i32_1 = arith.constant 0 : i32
    return %2, %c0_i32_0 : i32, i32
  }
  func.func @transform_1(%arg0: i32, %arg1: i32) -> (i32, i32) {
    %c1_i32 = arith.constant 1 : i32
    %0 = arith.muli %arg0, %c1_i32 : i32
    %1 = arith.addi %0, %arg1 : i32
    %c0_i32 = arith.constant 0 : i32
    %2 = arith.minsi %1, %c0_i32 : i32
    %c0_i32_0 = arith.constant 0 : i32
    %c0_i32_1 = arith.constant 0 : i32
    return %2, %c0_i32_0 : i32, i32
  }
  func.func @transform_2(%arg0: i32, %arg1: i32) -> (i32, i32) {
    %c0_i32 = arith.constant 0 : i32
    %c0_i32_0 = arith.constant 0 : i32
    return %arg0, %c0_i32 : i32, i32
  }
}

</mosaic_0001>

<bundles_post_ra>
// kernel: tpu_custom_call.1
= control target key start
LH: loop header
LB: loop body
LE: loop exit
PB: predicated region body
PF: predicated region fallthrough
CT: control target
= control target key end

     0   :  { %7 = vsyncpa [#allocation4], 0  ;;  %s641_s0 = inlined_call_operand.hbm [shape: f32[2,1024], index: 0, kind: input, shape index: {}]   ;;  %s642_s1 = inlined_call_operand.hbm [shape: f32[2,1024], index: 1, kind: input, shape index: {}]   ;;  %s643_s2 = inlined_call_operand.hbm [shape: f32[1,1], index: 2, kind: output, shape index: {}]  }
   0x1   :  { %8 = vsyncpa [#allocation7], 0 }
   0x2   :  { %9 = vsyncpa [#allocation5], 0 }
   0x3   :  { %21 = vsyncadd [#allocation4], 768  ;;  %s27_s11 = sshll.u32 %s641_s0, 4  ;;  %s604_s12 = smov [#allocation3]   ;;  %s28_s11 = int_to_ptr.hbm [resolvable:$true] %s27_s11 }
   0x4   :  { %s29_s13 = sshll.u32 %s604_s12, 4  ;;  %s605_s14 = smov 256   ;;  %s30_s13 = int_to_ptr.vmem [resolvable:$true] %s29_s13 }
   0x5   :  { %s606_s15 = smov 16  }
   0x6   :  { %35 = dma.hbm_to_vmem [thread:$0]  %s28_s11, 256, %s30_s13, [#allocation4], %s605_s14, %s605_s14, %s606_s15  }
   0x7   :  { %47 = vsyncadd [#allocation7], 768  ;;  %s53_s18 = sshll.u32 %s642_s1, 4  ;;  %s607_s19 = smov [#allocation6]   ;;  %s54_s18 = int_to_ptr.hbm [resolvable:$true] %s53_s18 }
   0x8   :  { %s55_s20 = sshll.u32 %s607_s19, 4  ;;  %s56_s20 = int_to_ptr.vmem [resolvable:$true] %s55_s20 }
   0x9   :  { %61 = dma.hbm_to_vmem [thread:$0]  %s54_s18, 256, %s56_s20, [#allocation7], %s605_s14, %s605_s14, %s606_s15  }
   0xa   :  { %598 = dma.done.wait [#allocation4], 1024  }
   0xb   :  { %599 = vsyncadd [#allocation4], 4294966272 }
   0xc   :  { %600 = dma.done.wait [#allocation7], 1024  }
   0xd   :  { %601 = vsyncadd [#allocation7], 4294966272  ;;  %v301_v0 = vld [vmem:[#allocation6] sm:$0xff]  ;;  %v302_v1 = vld [vmem:[#allocation6 + $0x8] sm:$0xff]  ;;  %s499_s21 = sshll.u32 %s643_s2, 4  ;;  %s608_s23 = smov [#allocation8]   ;;  %s500_s21 = int_to_ptr.hbm [resolvable:$true] %s499_s21 }
   0xe   :  { %v303_v2 = vld [vmem:[#allocation6 + $0x10] sm:$0xff]  ;;  %v304_v3 = vld [vmem:[#allocation6 + $0x18] sm:$0xff]  ;;  %v305_v4 = vld [vmem:[#allocation6 + $0x20] sm:$0xff]  ;;  %v325_v6 = vmul.f32 -0.5, %v301_v0  ;;  %v326_v7 = vmul.f32 -0.5, %v302_v1 }
   0xf   :  { %v306_v5 = vld [vmem:[#allocation6 + $0x28] sm:$0xff]  ;;  %v307_v8 = vld [vmem:[#allocation6 + $0x30] sm:$0xff]  ;;  %v308_v9 = vld [vmem:[#allocation6 + $0x38] sm:$0xff]  ;;  %v327_v10 = vmul.f32 -0.5, %v303_v2  ;;  %v328_v11 = vmul.f32 -0.5, %v304_v3  ;;  %v329_v12 = vmul.f32 -0.5, %v305_v4 }
  0x10   :  { %v330_v13 = vmul.f32 -0.5, %v306_v5  ;;  %v331_v14 = vmul.f32 -0.5, %v307_v8  ;;  %v333_v15 = vmul.f32 1.442695, %v325_v6  ;;  %v335_v16 = vmul.f32 1.442695, %v326_v7 }
  0x11   :  { %v332_v17 = vmul.f32 -0.5, %v308_v9  ;;  %v337_v18 = vmul.f32 1.442695, %v327_v10  ;;  %v339_v19 = vmul.f32 1.442695, %v328_v11  ;;  %v293_v20 = vld [vmem:[#allocation3] sm:$0xff] }
  0x12   :  { %522 = vpow2.f32 %v333_v15  ;;  %v341_v21 = vmul.f32 1.442695, %v329_v12  ;;  %v294_v22 = vld [vmem:[#allocation3 + $0x8] sm:$0xff]  ;;  %v343_v23 = vmul.f32 1.442695, %v330_v13  ;;  %v295_v24 = vld [vmem:[#allocation3 + $0x10] sm:$0xff]  ;;  %v309_v27 = vsub.f32 %v301_v0, %v293_v20 }
  0x13   :  { %524 = vpow2.f32 %v335_v16  ;;  %v345_v25 = vmul.f32 1.442695, %v331_v14  ;;  %v296_v26 = vld [vmem:[#allocation3 + $0x18] sm:$0xff]  ;;  %v347_v28 = vmul.f32 1.442695, %v332_v17  ;;  %v297_v29 = vld [vmem:[#allocation3 + $0x20] sm:$0xff]  ;;  %v310_v30 = vsub.f32 %v302_v1, %v294_v22 }
  0x14   :  { %526 = vpow2.f32 %v337_v18  ;;  %v298_v31 = vld [vmem:[#allocation3 + $0x28] sm:$0xff]  ;;  %v311_v32 = vsub.f32 %v303_v2, %v295_v24  ;;  %v299_v34 = vld [vmem:[#allocation3 + $0x30] sm:$0xff]  ;;  %v312_v35 = vsub.f32 %v304_v3, %v296_v26  ;;  %v300_v37 = vld [vmem:[#allocation3 + $0x38] sm:$0xff]  ;;  %v313_v38 = vsub.f32 %v305_v4, %v297_v29 }
  0x15   :  { %528 = vpow2.f32 %v339_v19  ;;  %v317_v39 = vmul.f32 %v309_v27, %v309_v27  ;;  %v314_v42 = vsub.f32 %v306_v5, %v298_v31  ;;  %v318_v43 = vmul.f32 %v310_v30, %v310_v30 }
  0x16   :  { %530 = vpow2.f32 %v341_v21  ;;  %v315_v46 = vsub.f32 %v307_v8, %v299_v34  ;;  %v319_v47 = vmul.f32 %v311_v32, %v311_v32  ;;  %v316_v51 = vsub.f32 %v308_v9, %v300_v37 }
  0x17   :  { %532 = vpow2.f32 %v343_v23  ;;  %v320_v52 = vmul.f32 %v312_v35, %v312_v35  ;;  %v321_v56 = vmul.f32 %v313_v38, %v313_v38  ;;  %v322_v61 = vmul.f32 %v314_v42, %v314_v42 }
  0x18   :  { %v523_v33 = vpop.eup %522  ;;  %534 = vpow2.f32 %v345_v25  ;;  %v323_v2 = vmul.f32 %v315_v46, %v315_v46  ;;  %v324_v6 = vmul.f32 %v316_v51, %v316_v51  ;;  %v373_v16 = vlaneseq }
  0x19   :  { %v525_v36 = vpop.eup %524  ;;  %536 = vpow2.f32 %v347_v28  ;;  %v349_v40 = vmul.f32 0.9, %v523_v33 }
  0x1a   :  { %v527_v41 = vpop.eup %526  ;;  %v350_v44 = vmul.f32 0.9, %v525_v36  ;;  %v374_v17 = vshrl.u32 %v373_v16, 7 }
  0x1b   :  { %v529_v45 = vpop.eup %528  ;;  %v351_v48 = vmul.f32 0.9, %v527_v41  ;;  %v357_v49 = vsub.f32 1.0, %v349_v40 }
  0x1c   :  { %v531_v50 = vpop.eup %530  ;;  %v352_v53 = vmul.f32 0.9, %v529_v45  ;;  %v358_v54 = vsub.f32 1.0, %v350_v44  ;;  %vm376_vm0 = vcmp.lt.s32.totalorder %v374_v17, 2 }
  0x1d   :  { %v533_v55 = vpop.eup %532  ;;  %v353_v57 = vmul.f32 0.9, %v531_v50  ;;  %v359_v58 = vsub.f32 1.0, %v351_v48  ;;  %v365_v59 = vmul.f32 %v357_v49, %v317_v39 }
  0x1e   :  { %v535_v60 = vpop.eup %534  ;;  %v354_v62 = vmul.f32 0.9, %v533_v55  ;;  %v360_v63 = vsub.f32 1.0, %v352_v53  ;;  %v366_v0 = vmul.f32 %v358_v54, %v318_v43 }
  0x1f   :  { %v537_v1 = vpop.eup %536  ;;  %v355_v3 = vmul.f32 0.9, %v535_v60  ;;  %v361_v4 = vsub.f32 1.0, %v353_v57  ;;  %v367_v5 = vmul.f32 %v359_v58, %v319_v47  ;;  %385 = vst [vmem:[#allocation1] ss:$4 sm:$0xff] %v365_v59 }
  0x20   :  { %v356_v7 = vmul.f32 0.9, %v537_v1  ;;  %v362_v8 = vsub.f32 1.0, %v354_v62  ;;  %v368_v9 = vmul.f32 %v360_v63, %v320_v52  ;;  %393 = vst [vmem:[#allocation1 + $0x20] ss:$4 sm:$0xff] %v366_v0 }
  0x21   :  { %v363_v10 = vsub.f32 1.0, %v355_v3  ;;  %v369_v11 = vmul.f32 %v361_v4, %v321_v56  ;;  %387 = vst [vmem:[#allocation1 + $0x1] ss:$4 sm:$0xff] %v367_v5 }
  0x22   :  { %v364_v12 = vsub.f32 1.0, %v356_v7  ;;  %v370_v13 = vmul.f32 %v362_v8, %v322_v61  ;;  %395 = vst [vmem:[#allocation1 + $0x21] ss:$4 sm:$0xff] %v368_v9 }
  0x23   :  { %v371_v14 = vmul.f32 %v363_v10, %v323_v2  ;;  %389 = vst [vmem:[#allocation1 + $0x2] ss:$4 sm:$0xff] %v369_v11 }
  0x24   :  { %v372_v15 = vmul.f32 %v364_v12, %v324_v6  ;;  %397 = vst [vmem:[#allocation1 + $0x22] ss:$4 sm:$0xff] %v370_v13 }
  0x25   :  { %391 = vst [vmem:[#allocation1 + $0x3] ss:$4 sm:$0xff] %v371_v14 }
  0x26   :  { %399 = vst [vmem:[#allocation1 + $0x23] ss:$4 sm:$0xff] %v372_v15 }
  0x2c   :  { %v400_v18 = vld.sshfl [vmem:[#allocation1] sm:$0xff pattern:$0x73625140]  ;;  %v401_v19 = vld.sshfl [vmem:[#allocation1 + $0x8] sm:$0xff pattern:$0x73625140] }
  0x2d   :  { %v402_v20 = vld.sshfl [vmem:[#allocation1 + $0x10] sm:$0xff pattern:$0x73625140]  ;;  %v403_v21 = vld.sshfl [vmem:[#allocation1 + $0x18] sm:$0xff pattern:$0x73625140] }
  0x2e   :  { %v416_v22 = vsel %vm376_vm0, %v400_v18, 0.0  ;;  %v417_v23 = vsel %vm376_vm0, %v401_v19, 0.0  ;;  %v418_v24 = vsel %vm376_vm0, %v402_v20, 0.0  ;;  %v404_v25 = vld.sshfl [vmem:[#allocation1 + $0x20] sm:$0xff pattern:$0x73625140] }
  0x2f   :  { %v476_v26 = vadd.f32 %v417_v23, %v416_v22  ;;  %v419_v27 = vsel %vm376_vm0, %v403_v21, 0.0  ;;  %v405_v28 = vld.sshfl [vmem:[#allocation1 + $0x28] sm:$0xff pattern:$0x73625140]  ;;  %v420_v30 = vsel %vm376_vm0, %v404_v25, 0.0 }
  0x30   :  { %v406_v31 = vld.sshfl [vmem:[#allocation1 + $0x30] sm:$0xff pattern:$0x73625140]  ;;  %v421_v33 = vsel %vm376_vm0, %v405_v28, 0.0 }
  0x31   :  { %v477_v29 = vadd.f32 %v476_v26, %v418_v24  ;;  %v407_v34 = vld.sshfl [vmem:[#allocation1 + $0x38] sm:$0xff pattern:$0x73625140]  ;;  %v422_v36 = vsel %vm376_vm0, %v406_v31, 0.0 }
  0x32   :  { %v423_v38 = vsel %vm376_vm0, %v407_v34, 0.0 }
  0x33   :  { %v478_v32 = vadd.f32 %v477_v29, %v419_v27 }
  0x35   :  { %v479_v35 = vadd.f32 %v478_v32, %v420_v30 }
  0x37   :  { %v480_v37 = vadd.f32 %v479_v35, %v421_v33 }
  0x39   :  { %v481_v39 = vadd.f32 %v480_v37, %v422_v36 }
  0x3b   :  { %v482_v40 = vadd.f32 %v481_v39, %v423_v38 }
  0x3d   :  { %483 = vadd.xlane.f32.xlu0 %v482_v40 }
  0xb0   :  { %v484_v41 = vpop.xlane.xlu0 %483 }
  0xb1   :  { %v485_v42 = vrot.slane %v484_v41, 4 }
  0xb3   :  { %v486_v43 = vadd.f32 %v485_v42, %v484_v41 }
  0xb5   :  { %v487_v44 = vrot.slane %v486_v43, 2 }
  0xb7   :  { %v488_v45 = vadd.f32 %v487_v44, %v486_v43 }
  0xb9   :  { %v489_v46 = vrot.slane %v488_v45, 1 }
  0xbb   :  { %v490_v47 = vadd.f32 %v489_v46, %v488_v45 }
  0xbd   :  { %515 = vpush %v490_v47 }
  0xee   :  { %s516_s22 = spop %515 }
  0xef   :  { %493 = sst [smem:[#allocation8]] %s516_s22 }
  0xf0   :  { %502 = dma.smem_to_hbm %s608_s23, 16, %s500_s21, [#allocation5]  }
  0xf1   :  { %602 = dma.done.wait [#allocation5], 16  }
  0xf2   :  { %603 = vsyncadd [#allocation5], 4294967280 }
  0xf3   :  { %507 = sfence }
  0xf4   :  { %508 = vsyncpa [#allocation4], 1 }
  0xf5   :  { %509 = vsyncpa [#allocation7], 1 }
  0xf6   :  { %510 = vsyncpa [#allocation5], 1 }

</bundles_post_ra>
